<compile_context>
chip_gen: v7x
topology: tpu7x:2x2x1
jax: 0.10.0
libtpu: 0.0.40
codegen_flags: <defaults>
</compile_context>

<pallas_src>
import jax
import jax.numpy as jnp
from jax.experimental import pallas as pl
from jax.experimental.pallas import tpu as pltpu

LANE = 128          # class dim zero-padded to a full lane width
DEF_TILE_N = 256    # output-row tile (MXU M fill + per-step overhead amortization)
DEF_TILE_K = 512    # reduction (A column / Z row) tile


def _round_up(v, m):
    return (v + m - 1) // m * m


def _choose_tiles(n):
    """Pick (tile_n, tile_k, n_pad) with tile_n | n_pad and tile_k | n_pad."""
    n128 = _round_up(max(n, 1), LANE)
    if n128 <= DEF_TILE_K:
        return n128, n128, n128            # single block per axis for small graphs
    return DEF_TILE_N, DEF_TILE_K, _round_up(n, DEF_TILE_K)


def _spmm_kernel(a_ref, z_ref, b_ref, o_ref, acc_ref):
    """out[row tile] = sum_k A_hat[row tile, k tile] @ Z[k tile]  (+ bias at end)."""
    k = pl.program_id(1)

    @pl.when(k == 0)
    def _():
        acc_ref[...] = jnp.zeros_like(acc_ref)

    # bf16 x bf16 on the MXU, f32 accumulation; no in-kernel casts.
    acc_ref[...] += jnp.dot(a_ref[...], z_ref[...],
                            preferred_element_type=jnp.float32)

    @pl.when(k == pl.num_programs(1) - 1)
    def _():
        o_ref[...] = (acc_ref[...] + b_ref[...]).astype(o_ref.dtype)


def _make_spmm(n_pad, c_pad, tile_n, tile_k, out_dtype):
    grid = (n_pad // tile_n, n_pad // tile_k)
    out_bytes = jnp.dtype(out_dtype).itemsize
    # Double-buffered A / Z / out blocks + f32 accumulator + bias (+ headroom).
    vmem_bytes = (2 * tile_n * tile_k * 2
                  + 2 * tile_k * c_pad * 2
                  + 2 * tile_n * c_pad * out_bytes
                  + tile_n * c_pad * 4
                  + 2 * 8 * c_pad * 4)
    vmem_limit = int(min(64 << 20, 2 * vmem_bytes + (2 << 20)))
    cost = pl.CostEstimate(
        flops=2 * n_pad * n_pad * c_pad,
        transcendentals=0,
        bytes_accessed=(n_pad * n_pad * 2 + n_pad * c_pad * 2
                        + n_pad * c_pad * out_bytes + c_pad * 4))
    return pl.pallas_call(
        _spmm_kernel,
        out_shape=jax.ShapeDtypeStruct((n_pad, c_pad), out_dtype),
        grid=grid,
        in_specs=[
            pl.BlockSpec((tile_n, tile_k), lambda i, k: (i, k)),   # A_hat (bf16, streamed)
            pl.BlockSpec((tile_k, c_pad), lambda i, k: (k, 0)),    # Z (bf16, streamed)
            pl.BlockSpec((1, c_pad), lambda i, k: (0, 0)),         # bias (tiny, resident)
        ],
        out_specs=pl.BlockSpec((tile_n, c_pad), lambda i, k: (i, 0)),
        scratch_shapes=[pltpu.VMEM((tile_n, c_pad), jnp.float32)],
        compiler_params=pltpu.CompilerParams(
            dimension_semantics=("parallel", "arbitrary"),
            vmem_limit_bytes=vmem_limit),
        cost_estimate=cost,
    )


def sgc_forward(a_hat_bf16, z0_bf16, b_pad, hop, *, tile_n, tile_k):
    """hop SpMM passes Z <- A_hat @ Z; bias folded into the final pass.

    a_hat_bf16: [Np, Np] bf16, z0_bf16: [Np, Cp] bf16, b_pad: [1, Cp] f32.
    """
    assert hop >= 1
    n_pad, c_pad = z0_bf16.shape
    assert a_hat_bf16.shape == (n_pad, n_pad)
    spmm_mid = _make_spmm(n_pad, c_pad, tile_n, tile_k, jnp.bfloat16)
    spmm_last = _make_spmm(n_pad, c_pad, tile_n, tile_k, jnp.float32)
    zero_b = jnp.zeros_like(b_pad)
    z = z0_bf16
    for _ in range(hop - 1):
        z = spmm_mid(a_hat_bf16, z, zero_b)      # bf16 carried between hops
    return spmm_last(a_hat_bf16, z, b_pad)       # final hop: f32 out + bias


def build_normalized_adjacency_padded(edge_index, num_nodes, n_pad,
                                      edge_weights=None, out_dtype=jnp.bfloat16):
    """Dense symmetric GCN normalization D^{-1/2}(A + I)D^{-1/2}, built directly
    in the padded [n_pad, n_pad] buffer and cast once to the streaming dtype."""
    src, tgt = edge_index[0], edge_index[1]
    ew = (jnp.ones(src.shape, jnp.float32) if edge_weights is None
          else edge_weights.astype(jnp.float32))
    a = jnp.zeros((n_pad, n_pad), jnp.float32)
    a = a.at[tgt, src].add(ew)
    # TODO(synk): if edge_index already contains self-loops, PyG's gcn_norm
    # replaces them with weight 1 rather than adding on top.
    idx = jnp.arange(num_nodes)
    a = a.at[idx, idx].add(1.0)
    deg = jnp.sum(a, axis=1)
    d_inv_sqrt = jnp.where(deg > 0, jax.lax.rsqrt(deg), 0.0)
    return (d_inv_sqrt[:, None] * a * d_inv_sqrt[None, :]).astype(out_dtype)


def sgcnet_forward(x, edge_index, w, b, hop, edge_weights=None):
    """Equivalent of SGCNet.forward(x, edge_index, edge_weights)."""
    n, f_in = x.shape
    c = w.shape[1]
    tile_n, tile_k, n_pad = _choose_tiles(n)
    c_pad = _round_up(c, LANE)

    a_hat = build_normalized_adjacency_padded(edge_index, n, n_pad, edge_weights)

    # Z0 = X @ W in plain XLA: a K=F, lane-sparse GEMM is not worth a kernel.
    w_pad = jnp.zeros((f_in, c_pad), jnp.float32).at[:, :c].set(w)
    b_pad = jnp.zeros((1, c_pad), jnp.float32).at[:, :c].set(b.reshape(1, -1))
    z0 = jnp.zeros((n_pad, c_pad), jnp.bfloat16).at[:n, :].set(
        (x @ w_pad).astype(jnp.bfloat16))

    out = sgc_forward(a_hat, z0, b_pad, hop, tile_n=tile_n, tile_k=tile_k)
    return out[:n, :c]


if __name__ == "__main__":
    key = jax.random.PRNGKey(0)

    # Small deterministic synthetic problem.
    N = 256        # nodes
    F_IN = 16      # num_features
    C = 8          # num_classes
    HOP = 2        # SGConv K
    E = 1024       # random directed edges (symmetrized below)

    k_x, k_e, k_w, k_b = jax.random.split(key, 4)

    x = jax.random.normal(k_x, (N, F_IN), jnp.float32)
    edges = jax.random.randint(k_e, (2, E), 0, N, dtype=jnp.int32)
    edge_index = jnp.concatenate([edges, edges[::-1]], axis=1)   # undirected

    w = jax.random.normal(k_w, (F_IN, C), jnp.float32) * (1.0 / jnp.sqrt(F_IN))
    b = jax.random.normal(k_b, (C,), jnp.float32) * 0.1

    out = sgcnet_forward(x, edge_index, w, b, HOP)
    out = jax.block_until_ready(out)
    assert out.shape == (N, C)

    # Plain-JAX reference with the same bf16 quantization of A_hat and the same
    # bf16 Z carry between hops (kernel accumulates in f32).
    _, _, n_pad_ref = _choose_tiles(N)
    a_ref = build_normalized_adjacency_padded(edge_index, N, n_pad_ref)
    a_ref = a_ref[:N, :N].astype(jnp.float32)
    z_ref = (x @ w).astype(jnp.bfloat16).astype(jnp.float32)
    for k in range(HOP):
        z_ref = a_ref @ z_ref
        if k < HOP - 1:
            z_ref = z_ref.astype(jnp.bfloat16).astype(jnp.float32)
    z_ref = z_ref + b[None, :]
    max_err = float(jnp.max(jnp.abs(out - z_ref)))
    assert max_err < 5e-2, f"max abs error {max_err}"

    print("KERNEL_OK")
</pallas_src>

<mosaic_0001>
module attributes {stable_mosaic.version = 11 : i64} {
  func.func @_spmm_kernel(%arg0: i32, %arg1: i32, %arg2: memref<256x256xbf16, #tpu.memory_space<vmem>>, %arg3: memref<256x128xbf16, #tpu.memory_space<vmem>>, %arg4: memref<1x128xf32, #tpu.memory_space<vmem>>, %arg5: memref<256x128xbf16, #tpu.memory_space<vmem>>, %arg6: memref<256x128xf32, #tpu.memory_space<vmem>>) attributes {dimension_semantics = [#tpu.dimension_semantics<parallel>, #tpu.dimension_semantics<arbitrary>], iteration_bounds = array<i64: 1, 1>, scalar_prefetch = 0 : i64, scratch_operands = 1 : i64, tpu.core_type = #tpu.core_type<tc>, window_params = [{transform_indices = @transform_0, window_bounds = array<i64: 256, 256>}, {transform_indices = @transform_1, window_bounds = array<i64: 256, 128>}, {pipeline_mode = #tpu.pipeline_mode<synchronous>, transform_indices = @transform_2, window_bounds = array<i64: 1, 128>}, {transform_indices = @transform_3, window_bounds = array<i64: 256, 128>}]} {
    %c0_i32 = arith.constant 0 : i32
    %0 = arith.cmpi eq, %arg1, %c0_i32 : i32
    %1 = arith.extui %0 : i1 to i32
    %c0_i32_0 = arith.constant 0 : i32
    %2 = arith.cmpi ne, %1, %c0_i32_0 : i32
    scf.if %2 {
      %cst_10 = arith.constant 0.000000e+00 : f32
      %12 = vector.broadcast %cst_10 : f32 to vector<256x128xf32>
      %c0_11 = arith.constant 0 : index
      %c0_12 = arith.constant 0 : index
      %13 = vector.load %arg6[%c0_11, %c0_12] : memref<256x128xf32, #tpu.memory_space<vmem>>, vector<256x128xf32>
      tpu.vector_store %arg6[%c0_11, %c0_12], %12 {strides = array<i32>} : memref<256x128xf32, #tpu.memory_space<vmem>>, vector<256x128xf32>,
    } else {
    }
    %c0 = arith.constant 0 : index
    %c0_1 = arith.constant 0 : index
    %3 = vector.load %arg6[%c0, %c0_1] : memref<256x128xf32, #tpu.memory_space<vmem>>, vector<256x128xf32>
    %c0_2 = arith.constant 0 : index
    %c0_3 = arith.constant 0 : index
    %4 = vector.load %arg2[%c0_2, %c0_3] : memref<256x256xbf16, #tpu.memory_space<vmem>>, vector<256x256xbf16>
    %c0_4 = arith.constant 0 : index
    %c0_5 = arith.constant 0 : index
    %5 = vector.load %arg3[%c0_4, %c0_5] : memref<256x128xbf16, #tpu.memory_space<vmem>>, vector<256x128xbf16>
    %cst = arith.constant dense<0.000000e+00> : vector<256x128xf32>
    %6 = tpu.matmul %4, %5, %cst {dimension_numbers = #tpu.dot_dimension_numbers<[1], [0], [0], [1], [0, 0, 1, 1], [], []>} : vector<256x256xbf16>, vector<256x128xbf16>, vector<256x128xf32> -> vector<256x128xf32>
    %7 = arith.addf %3, %6 : vector<256x128xf32>
    %c0_6 = arith.constant 0 : index
    %c0_7 = arith.constant 0 : index
    %8 = vector.load %arg6[%c0_6, %c0_7] : memref<256x128xf32, #tpu.memory_space<vmem>>, vector<256x128xf32>
    tpu.vector_store %arg6[%c0_6, %c0_7], %7 {strides = array<i32>} : memref<256x128xf32, #tpu.memory_space<vmem>>, vector<256x128xf32>,
    %c0_i32_8 = arith.constant 0 : i32
    %9 = arith.cmpi eq, %arg1, %c0_i32_8 : i32
    %10 = arith.extui %9 : i1 to i32
    %c0_i32_9 = arith.constant 0 : i32
    %11 = arith.cmpi ne, %10, %c0_i32_9 : i32
    scf.if %11 {
      %c0_10 = arith.constant 0 : index
      %c0_11 = arith.constant 0 : index
      %12 = vector.load %arg6[%c0_10, %c0_11] : memref<256x128xf32, #tpu.memory_space<vmem>>, vector<256x128xf32>
      %c0_12 = arith.constant 0 : index
      %c0_13 = arith.constant 0 : index
      %13 = vector.load %arg4[%c0_12, %c0_13] : memref<1x128xf32, #tpu.memory_space<vmem>>, vector<1x128xf32>
      %14 = vector.broadcast %13 : vector<1x128xf32> to vector<256x128xf32>
      %15 = arith.addf %12, %14 : vector<256x128xf32>
      %16 = arith.truncf %15 : vector<256x128xf32> to vector<256x128xbf16>
      %c0_14 = arith.constant 0 : index
      %c0_15 = arith.constant 0 : index
      %17 = vector.load %arg5[%c0_14, %c0_15] : memref<256x128xbf16, #tpu.memory_space<vmem>>, vector<256x128xbf16>
      tpu.vector_store %arg5[%c0_14, %c0_15], %16 {strides = array<i32>} : memref<256x128xbf16, #tpu.memory_space<vmem>>, vector<256x128xbf16>,
    } else {
    }
    return
  }
  func.func @transform_0(%arg0: i32, %arg1: i32) -> (i32, i32) {
    %c0_i32 = arith.constant 0 : i32
    return %arg0, %arg1 : i32, i32
  }
  func.func @transform_1(%arg0: i32, %arg1: i32) -> (i32, i32) {
    %c0_i32 = arith.constant 0 : i32
    %c0_i32_0 = arith.constant 0 : i32
    return %arg1, %c0_i32 : i32, i32
  }
  func.func @transform_2(%arg0: i32, %arg1: i32) -> (i32, i32) {
    %c0_i32 = arith.constant 0 : i32
    %c0_i32_0 = arith.constant 0 : i32
    %c0_i32_1 = arith.constant 0 : i32
    return %c0_i32, %c0_i32_0 : i32, i32
  }
  func.func @transform_3(%arg0: i32, %arg1: i32) -> (i32, i32) {
    %c0_i32 = arith.constant 0 : i32
    %c0_i32_0 = arith.constant 0 : i32
    return %arg0, %c0_i32 : i32, i32
  }
}

</mosaic_0001>

<bundles_post_ra>
// kernel: tpu_custom_call.1
= control target key start
LH: loop header
LB: loop body
LE: loop exit
PB: predicated region body
PF: predicated region fallthrough
CT: control target
= control target key end

     0   :  { %8 = vsyncpa [#allocation4], 0  ;;  %s1494_s0 = inlined_call_operand.hbm [shape: bf16[256,256], index: 0, kind: input, shape index: {}]   ;;  %s1495_s1 = inlined_call_operand.hbm [shape: bf16[256,128], index: 1, kind: input, shape index: {}]   ;;  %s1496_s2 = inlined_call_operand.vmem [shape: f32[1,128], index: 2, kind: input, shape index: {}]   ;;  %s1497_s3 = inlined_call_operand.hbm [shape: bf16[256,128], index: 3, kind: output, shape index: {}]  }
   0x1   :  { %9 = vsyncpa [#allocation7], 0 }
   0x2   :  { %10 = vsyncpa [#allocation5], 0  ;;  %s1388_s12 = smov [#allocation3]   ;;  %s1316_s16 = scalar_lea.hbm %s1494_s0, 4096 }
   0x3   :  { %s16_s13 = sshll.u32 %s1388_s12, 4  ;;  %p1317_p0 = scmp.ne.s32.totalorder %s1494_s0, %s1316_s16  ;;  %s17_s13 = int_to_ptr.vmem [resolvable:$true] %s16_s13 }
   0x4   :  { %p1320_p1 = scmp.lt.u32.totalorder %s1316_s16, %s1494_s0 }
   0x6   :  { %p1322_p2 = pnand %p1320_p1, %p1317_p0 }
   0x8   :  { %1325 = shalt.err (!%p1322_p2)
}
   0x9   :  { %s1326_s21 = scalar_lea.vmem %s17_s13, 4096  ;;  %p1331_p4 = scmp.lt.s32.totalorder %s17_s13, %s17_s13 }
   0xa   :  { %p1327_p3 = scmp.ne.s32.totalorder %s17_s13, %s1326_s21  ;;  %p1332_p5 = scmp.lt.s32.totalorder %s1326_s21, %s1326_s21 }
   0xc   :  { %p1333_p6 = por %p1332_p5, %p1331_p4 }
   0xe   :  { %p1334_p7 = pnand %p1333_p6, %p1327_p3 }
  0x10   :  { %1337 = shalt.err (!%p1334_p7)
}
  0x11   :  { %s1389_s22 = smov 128   ;;  %s1390_s23 = smov 8  }
  0x12   :  { %22 = dma.hbm_to_vmem [thread:$0]  %s1494_s0, 4096, %s17_s13, [#allocation4], %s1389_s22, %s1389_s22, %s1390_s23  }
  0x13   :  { %s1391_s26 = smov [#allocation6]   ;;  %s1338_s30 = scalar_lea.hbm %s1495_s1, 2048 }
  0x14   :  { %s28_s27 = sshll.u32 %s1391_s26, 4  ;;  %p1339_p8 = scmp.ne.s32.totalorder %s1495_s1, %s1338_s30  ;;  %s29_s27 = int_to_ptr.vmem [resolvable:$true] %s28_s27 }
  0x15   :  { %p1342_p9 = scmp.lt.u32.totalorder %s1338_s30, %s1495_s1 }
  0x17   :  { %p1344_p10 = pnand %p1342_p9, %p1339_p8 }
  0x19   :  { %1347 = shalt.err (!%p1344_p10)
}
  0x1a   :  { %s1348_s8 = scalar_lea.vmem %s29_s27, 2048  ;;  %p1353_p12 = scmp.lt.s32.totalorder %s29_s27, %s29_s27 }
  0x1b   :  { %p1349_p11 = scmp.ne.s32.totalorder %s29_s27, %s1348_s8  ;;  %p1354_p13 = scmp.lt.s32.totalorder %s1348_s8, %s1348_s8 }
  0x1d   :  { %p1355_p0 = por %p1354_p13, %p1353_p12 }
  0x1f   :  { %p1356_p1 = pnand %p1355_p0, %p1349_p11 }
  0x21   :  { %1359 = shalt.err (!%p1356_p1)
}
  0x22   :  { %s1392_s0 = smov 64   ;;  %s1393_s9 = smov 4  }
  0x23   :  { %34 = dma.hbm_to_vmem [thread:$0]  %s1495_s1, 2048, %s29_s27, [#allocation7], %s1392_s0, %s1392_s0, %s1393_s9  }
  0x24   :  { %1382 = dma.done.wait [#allocation4], 4096  }
  0x25   :  { %1383 = vsyncadd [#allocation4], 4294963200 }
  0x26   :  { %1384 = dma.done.wait [#allocation7], 2048  }
  0x27   :  { %1385 = vsyncadd [#allocation7], 4294965248  ;;  %v1252_v0 = vld [vmem:[#allocation6 + $0x40] sm:$0xff]   ;;  %v1254_v2 = vld [vmem:[#allocation6 + $0x48] sm:$0xff]  }
  0x28   :  { %v1253_v1 = vld [vmem:[#allocation6] sm:$0xff]   ;;  %1117 = vmatprep.subr.bf16.mxu0 %v1252_v0  ;;  %1229 = vmatprep.subr.bf16.mxu1 %v1252_v0  ;;  %v1255_v3 = vld [vmem:[#allocation6 + $0x8] sm:$0xff]   ;;  %v1256_v4 = vld [vmem:[#allocation6 + $0x50] sm:$0xff]  }
  0x29   :  { %1118 = vmatpush3.bf16.msra.mxu0 %v1253_v1  ;;  %1237 = vmatpush3.bf16.msra.mxu1 %v1253_v1  ;;  %v1257_v5 = vld [vmem:[#allocation6 + $0x10] sm:$0xff]   ;;  %v1258_v6 = vld [vmem:[#allocation6 + $0x58] sm:$0xff]   ;;  %v1260_v8 = vld [vmem:[#allocation6 + $0x60] sm:$0xff]  }
  0x2a   :  { %1119 = vmatprep.subr.bf16.mxu0 %v1254_v2  ;;  %1230 = vmatprep.subr.bf16.mxu1 %v1254_v2  ;;  %v1259_v7 = vld [vmem:[#allocation6 + $0x18] sm:$0xff]   ;;  %v1261_v9 = vld [vmem:[#allocation6 + $0x20] sm:$0xff]   ;;  %v1262_v10 = vld [vmem:[#allocation6 + $0x68] sm:$0xff]  }
  0x2b   :  { %v1270_v11 = vld [vmem:[#allocation3 + $0x4] ss:$8 sps:$4 sm:$0xff]   ;;  %v1264_v14 = vld [vmem:[#allocation6 + $0x70] sm:$0xff]   ;;  %v1266_v16 = vld [vmem:[#allocation6 + $0x78] sm:$0xff]  }
  0x2c   :  { %v1273_v12 = vld [vmem:[#allocation3 + $0x84] ss:$8 sps:$4 sm:$0xff]   ;;  %464 = vmatprep.mubr.bf16.mxu0 %v1270_v11  ;;  %v1265_v15 = vld [vmem:[#allocation6 + $0x30] sm:$0xff]   ;;  %v1267_v17 = vld [vmem:[#allocation6 + $0x38] sm:$0xff]  }
  0x2d   :  { %1120 = vmatpush3.bf16.msra.mxu0 %v1255_v3  ;;  %1238 = vmatpush3.bf16.msra.mxu1 %v1255_v3  ;;  %v1263_v13 = vld [vmem:[#allocation6 + $0x28] sm:$0xff]   ;;  %v1274_v20 = vld [vmem:[#allocation3 + $0x14] ss:$8 sps:$4 sm:$0xff]   ;;  %v1278_v22 = vld [vmem:[#allocation3 + $0x10] ss:$8 sps:$4 sm:$0xff]  }
  0x2e   :  { %1121 = vmatprep.subr.bf16.mxu0 %v1256_v4  ;;  %1231 = vmatprep.subr.bf16.mxu1 %v1256_v4  ;;  %v1268_v18 = vld [vmem:[#allocation3] ss:$8 sps:$4 sm:$0xff]   ;;  %v1276_v21 = vld [vmem:[#allocation3 + $0x94] ss:$8 sps:$4 sm:$0xff]   ;;  %v1279_v23 = vld [vmem:[#allocation3 + $0x90] ss:$8 sps:$4 sm:$0xff]  }
  0x2f   :  { %528 = vmatprep.mubr.bf16.mxu1 %v1273_v12  ;;  %v1271_v19 = vld [vmem:[#allocation3 + $0x80] ss:$8 sps:$4 sm:$0xff]   ;;  %v1280_v24 = vld [vmem:[#allocation3 + $0x24] ss:$8 sps:$4 sm:$0xff]   ;;  %v1286_v28 = vld [vmem:[#allocation3 + $0x34] ss:$8 sps:$4 sm:$0xff]  }
  0x30   :  { %v1282_v25 = vld [vmem:[#allocation3 + $0xa4] ss:$8 sps:$4 sm:$0xff]   ;;  %v1284_v26 = vld [vmem:[#allocation3 + $0x20] ss:$8 sps:$4 sm:$0xff]   ;;  %v1288_v29 = vld [vmem:[#allocation3 + $0xb4] ss:$8 sps:$4 sm:$0xff]  }
  0x31   :  { %1122 = vmatpush3.bf16.msra.mxu0 %v1257_v5  ;;  %1239 = vmatpush3.bf16.msra.mxu1 %v1257_v5  ;;  %v1285_v27 = vld [vmem:[#allocation3 + $0xa0] ss:$8 sps:$4 sm:$0xff]   ;;  %v1290_v30 = vld [vmem:[#allocation3 + $0x30] ss:$8 sps:$4 sm:$0xff]   ;;  %v1292_v32 = vld [vmem:[#allocation3 + $0x44] ss:$8 sps:$4 sm:$0xff]  }
  0x32   :  { %1123 = vmatprep.subr.bf16.mxu0 %v1258_v6  ;;  %1232 = vmatprep.subr.bf16.mxu1 %v1258_v6  ;;  %v1291_v31 = vld [vmem:[#allocation3 + $0xb0] ss:$8 sps:$4 sm:$0xff]   ;;  %v1294_v33 = vld [vmem:[#allocation3 + $0xc4] ss:$8 sps:$4 sm:$0xff]   ;;  %v1296_v34 = vld [vmem:[#allocation3 + $0x40] ss:$8 sps:$4 sm:$0xff]  }
  0x33   :  { %v1297_v35 = vld [vmem:[#allocation3 + $0xc0] ss:$8 sps:$4 sm:$0xff]   ;;  %v1298_v36 = vld [vmem:[#allocation3 + $0x54] ss:$8 sps:$4 sm:$0xff]   ;;  %v1302_v38 = vld [vmem:[#allocation3 + $0x50] ss:$8 sps:$4 sm:$0xff]  }
  0x34   :  { %v1300_v37 = vld [vmem:[#allocation3 + $0xd4] ss:$8 sps:$4 sm:$0xff]   ;;  %v1303_v39 = vld [vmem:[#allocation3 + $0xd0] ss:$8 sps:$4 sm:$0xff]   ;;  %v1304_v40 = vld [vmem:[#allocation3 + $0x64] ss:$8 sps:$4 sm:$0xff]  }
  0x35   :  { %1124 = vmatpush3.bf16.msra.mxu0 %v1259_v7  ;;  %1240 = vmatpush3.bf16.msra.mxu1 %v1259_v7  ;;  %v1306_v41 = vld [vmem:[#allocation3 + $0xe4] ss:$8 sps:$4 sm:$0xff]   ;;  %v1308_v42 = vld [vmem:[#allocation3 + $0x60] ss:$8 sps:$4 sm:$0xff]   ;;  %v1310_v44 = vld [vmem:[#allocation3 + $0x74] ss:$8 sps:$4 sm:$0xff]  }
  0x36   :  { %1125 = vmatprep.subr.bf16.mxu0 %v1260_v8  ;;  %1233 = vmatprep.subr.bf16.mxu1 %v1260_v8  ;;  %v1309_v43 = vld [vmem:[#allocation3 + $0xe0] ss:$8 sps:$4 sm:$0xff]   ;;  %v1312_v45 = vld [vmem:[#allocation3 + $0xf4] ss:$8 sps:$4 sm:$0xff]   ;;  %v1314_v46 = vld [vmem:[#allocation3 + $0x70] ss:$8 sps:$4 sm:$0xff]  }
  0x37   :  { %v1315_v47 = vld [vmem:[#allocation3 + $0xf0] ss:$8 sps:$4 sm:$0xff]   ;;  %v1445_v56 = vld [vmem:[%s1496_s2] ss:$0 sm:$0xff]  ;;  %s1394_s2 = smov [#allocation8]  }
  0x38   :  { %s896_s13 = sshll.u32 %s1394_s2, 4  ;;  %s897_s13 = int_to_ptr.vmem [resolvable:$true] %s896_s13 }
  0x39   :  { %1126 = vmatpush3.bf16.msra.mxu0 %v1261_v9  ;;  %1241 = vmatpush3.bf16.msra.mxu1 %v1261_v9  ;;  %s1360_s14 = scalar_lea.vmem %s897_s13, 2048  ;;  %p1365_p3 = scmp.lt.s32.totalorder %s897_s13, %s897_s13 }
  0x3a   :  { %1127 = vmatprep.subr.bf16.mxu0 %v1262_v10  ;;  %1234 = vmatprep.subr.bf16.mxu1 %v1262_v10  ;;  %p1361_p2 = scmp.ne.s32.totalorder %s897_s13, %s1360_s14  ;;  %p1366_p4 = scmp.lt.s32.totalorder %s1360_s14, %s1360_s14 }
  0x3c   :  { %p1367_p5 = por %p1366_p4, %p1365_p3 }
  0x3d   :  { %1128 = vmatpush3.bf16.msra.mxu0 %v1263_v13  ;;  %1242 = vmatpush3.bf16.msra.mxu1 %v1263_v13 }
  0x3e   :  { %1129 = vmatprep.subr.bf16.mxu0 %v1264_v14  ;;  %1235 = vmatprep.subr.bf16.mxu1 %v1264_v14  ;;  %p1368_p6 = pnand %p1367_p5, %p1361_p2 }
  0x41   :  { %1130 = vmatpush3.bf16.msra.mxu0 %v1265_v15  ;;  %1243 = vmatpush3.bf16.msra.mxu1 %v1265_v15 }
  0x42   :  { %1131 = vmatprep.subr.bf16.mxu0 %v1266_v16  ;;  %1236 = vmatprep.subr.bf16.mxu1 %v1266_v16 }
  0x45   :  { %1132 = vmatpush3.bf16.msra.mxu0 %v1267_v17  ;;  %1244 = vmatpush3.bf16.msra.mxu1 %v1267_v17 }
  0x48   :  { %465 = vmatmul.mubr.bf16.vlgmr.msra.gmra.mrb[0].mxu0 %v1268_v18  ;;  %529 = vmatmul.mubr.bf16.vlgmr.msra.gmra.mrb[0].mxu1 %v1271_v19 }
  0x49   :  { %472 = vmatprep.mubr.bf16.mxu0 %v1274_v20  ;;  %536 = vmatprep.mubr.bf16.mxu1 %v1276_v21 }
  0x50   :  { %473 = vmatmul.mubr.bf16.gmra.mrb[4].mxu0 %v1278_v22  ;;  %537 = vmatmul.mubr.bf16.gmra.mrb[4].mxu1 %v1279_v23 }
  0x51   :  { %480 = vmatprep.mubr.bf16.mxu0 %v1280_v24  ;;  %544 = vmatprep.mubr.bf16.mxu1 %v1282_v25 }
  0x58   :  { %481 = vmatmul.mubr.bf16.gmra.mrb[8].mxu0 %v1284_v26  ;;  %545 = vmatmul.mubr.bf16.gmra.mrb[8].mxu1 %v1285_v27 }
  0x59   :  { %488 = vmatprep.mubr.bf16.mxu0 %v1286_v28  ;;  %552 = vmatprep.mubr.bf16.mxu1 %v1288_v29 }
  0x60   :  { %489 = vmatmul.mubr.bf16.gmra.mrb[12].mxu0 %v1290_v30  ;;  %553 = vmatmul.mubr.bf16.gmra.mrb[12].mxu1 %v1291_v31 }
  0x61   :  { %496 = vmatprep.mubr.bf16.mxu0 %v1292_v32  ;;  %560 = vmatprep.mubr.bf16.mxu1 %v1294_v33 }
  0x68   :  { %497 = vmatmul.mubr.bf16.gmra.mrb[16].mxu0 %v1296_v34  ;;  %561 = vmatmul.mubr.bf16.gmra.mrb[16].mxu1 %v1297_v35 }
  0x69   :  { %504 = vmatprep.mubr.bf16.mxu0 %v1298_v36  ;;  %568 = vmatprep.mubr.bf16.mxu1 %v1300_v37 }
  0x70   :  { %505 = vmatmul.mubr.bf16.gmra.mrb[20].mxu0 %v1302_v38  ;;  %569 = vmatmul.mubr.bf16.gmra.mrb[20].mxu1 %v1303_v39 }
  0x71   :  { %512 = vmatprep.mubr.bf16.mxu0 %v1304_v40  ;;  %576 = vmatprep.mubr.bf16.mxu1 %v1306_v41 }
  0x78   :  { %513 = vmatmul.mubr.bf16.gmra.mrb[24].mxu0 %v1308_v42  ;;  %577 = vmatmul.mubr.bf16.gmra.mrb[24].mxu1 %v1309_v43 }
  0x79   :  { %520 = vmatprep.mubr.bf16.mxu0 %v1310_v44  ;;  %584 = vmatprep.mubr.bf16.mxu1 %v1312_v45 }
  0x80   :  { %521 = vmatmul.mubr.bf16.gmra.mrb[28].mxu0 %v1314_v46  ;;  %585 = vmatmul.mubr.bf16.gmra.mrb[28].mxu1 %v1315_v47 }
 0x11b   :  { %v1133_v48 = vpop.f32.mrb[0].mxu0  ;;  %v1181_v49 = vpop.f32.mrb[0].mxu1 }
 0x11c   :  { %v1134_v50 = vpop.f32.mrb[1].mxu0  ;;  %v1182_v51 = vpop.f32.mrb[1].mxu1 }
 0x11d   :  { %v1135_v52 = vadd.f32 %v1134_v50, %v1133_v48  ;;  %v1183_v53 = vadd.f32 %v1182_v51, %v1181_v49  ;;  %v1136_v54 = vpop.f32.mrb[2].mxu0  ;;  %v1184_v55 = vpop.f32.mrb[2].mxu1 }
 0x11e   :  { %v1137_v57 = vpop.f32.mrb[3].mxu0  ;;  %v1185_v58 = vpop.f32.mrb[3].mxu1 }
 0x11f   :  { %v1138_v59 = vadd.f32 %v1137_v57, %v1136_v54  ;;  %v1186_v60 = vadd.f32 %v1185_v58, %v1184_v55  ;;  %v699_v61 = vadd.f32 %v1135_v52, %v1445_v56  ;;  %v715_v62 = vadd.f32 %v1183_v53, %v1445_v56 }
 0x121   :  { %v700_v63 = vadd.f32 %v1138_v59, %v1445_v56  ;;  %v716_v0 = vadd.f32 %v1186_v60, %v1445_v56 }
 0x123   :  { %v1025_v1 = vpack.c.bf16 %v700_v63, %v699_v61  ;;  %v1065_v2 = vpack.c.bf16 %v716_v0, %v715_v62  ;;  %v1139_v3 = vpop.f32.mrb[4].mxu0  ;;  %v1187_v4 = vpop.f32.mrb[4].mxu1 }
 0x124   :  { %v1140_v5 = vpop.f32.mrb[5].mxu0  ;;  %v1188_v6 = vpop.f32.mrb[5].mxu1 }
 0x125   :  { %1026 = vst [vmem:[#allocation8] sm:$0xff] %v1025_v1   ;;  %1109 = vst [vmem:[#allocation8 + $0x40] sm:$0xff] %v1065_v2   ;;  %v1141_v7 = vadd.f32 %v1140_v5, %v1139_v3  ;;  %v1189_v8 = vadd.f32 %v1188_v6, %v1187_v4  ;;  %v1142_v9 = vpop.f32.mrb[6].mxu0  ;;  %v1190_v10 = vpop.f32.mrb[6].mxu1 }
 0x126   :  { %v1143_v11 = vpop.f32.mrb[7].mxu0  ;;  %v1191_v12 = vpop.f32.mrb[7].mxu1 }
 0x127   :  { %v1144_v13 = vadd.f32 %v1143_v11, %v1142_v9  ;;  %v1192_v14 = vadd.f32 %v1191_v12, %v1190_v10  ;;  %v701_v15 = vadd.f32 %v1141_v7, %v1445_v56  ;;  %v717_v16 = vadd.f32 %v1189_v8, %v1445_v56 }
 0x129   :  { %v702_v17 = vadd.f32 %v1144_v13, %v1445_v56  ;;  %v718_v18 = vadd.f32 %v1192_v14, %v1445_v56 }
 0x12b   :  { %v1030_v19 = vpack.c.bf16 %v702_v17, %v701_v15  ;;  %v1070_v20 = vpack.c.bf16 %v718_v18, %v717_v16  ;;  %v1145_v21 = vpop.f32.mrb[8].mxu0  ;;  %v1193_v22 = vpop.f32.mrb[8].mxu1 }
 0x12c   :  { %v1146_v23 = vpop.f32.mrb[9].mxu0  ;;  %v1194_v24 = vpop.f32.mrb[9].mxu1 }
 0x12d   :  { %1102 = vst [vmem:[#allocation8 + $0x8] sm:$0xff] %v1030_v19   ;;  %1110 = vst [vmem:[#allocation8 + $0x48] sm:$0xff] %v1070_v20   ;;  %v1147_v25 = vadd.f32 %v1146_v23, %v1145_v21  ;;  %v1195_v26 = vadd.f32 %v1194_v24, %v1193_v22  ;;  %v1148_v27 = vpop.f32.mrb[10].mxu0  ;;  %v1196_v28 = vpop.f32.mrb[10].mxu1 }
 0x12e   :  { %v1149_v29 = vpop.f32.mrb[11].mxu0  ;;  %v1197_v30 = vpop.f32.mrb[11].mxu1 }
 0x12f   :  { %v1150_v31 = vadd.f32 %v1149_v29, %v1148_v27  ;;  %v1198_v32 = vadd.f32 %v1197_v30, %v1196_v28  ;;  %v703_v33 = vadd.f32 %v1147_v25, %v1445_v56  ;;  %v719_v34 = vadd.f32 %v1195_v26, %v1445_v56 }
 0x131   :  { %v704_v35 = vadd.f32 %v1150_v31, %v1445_v56  ;;  %v720_v36 = vadd.f32 %v1198_v32, %v1445_v56 }
 0x133   :  { %v1035_v37 = vpack.c.bf16 %v704_v35, %v703_v33  ;;  %v1075_v38 = vpack.c.bf16 %v720_v36, %v719_v34  ;;  %v1151_v39 = vpop.f32.mrb[12].mxu0  ;;  %v1199_v40 = vpop.f32.mrb[12].mxu1 }
 0x134   :  { %v1152_v41 = vpop.f32.mrb[13].mxu0  ;;  %v1200_v42 = vpop.f32.mrb[13].mxu1 }
 0x135   :  { %1103 = vst [vmem:[#allocation8 + $0x10] sm:$0xff] %v1035_v37   ;;  %1111 = vst [vmem:[#allocation8 + $0x50] sm:$0xff] %v1075_v38   ;;  %v1153_v43 = vadd.f32 %v1152_v41, %v1151_v39  ;;  %v1201_v44 = vadd.f32 %v1200_v42, %v1199_v40  ;;  %v1154_v45 = vpop.f32.mrb[14].mxu0  ;;  %v1202_v46 = vpop.f32.mrb[14].mxu1 }
 0x136   :  { %v1155_v47 = vpop.f32.mrb[15].mxu0  ;;  %v1203_v48 = vpop.f32.mrb[15].mxu1 }
 0x137   :  { %v1156_v49 = vadd.f32 %v1155_v47, %v1154_v45  ;;  %v1204_v50 = vadd.f32 %v1203_v48, %v1202_v46  ;;  %v705_v51 = vadd.f32 %v1153_v43, %v1445_v56  ;;  %v721_v52 = vadd.f32 %v1201_v44, %v1445_v56 }
 0x139   :  { %v706_v53 = vadd.f32 %v1156_v49, %v1445_v56  ;;  %v722_v54 = vadd.f32 %v1204_v50, %v1445_v56 }
 0x13b   :  { %v1040_v55 = vpack.c.bf16 %v706_v53, %v705_v51  ;;  %v1080_v57 = vpack.c.bf16 %v722_v54, %v721_v52  ;;  %v1157_v58 = vpop.f32.mrb[16].mxu0  ;;  %v1205_v59 = vpop.f32.mrb[16].mxu1 }
 0x13c   :  { %v1158_v60 = vpop.f32.mrb[17].mxu0  ;;  %v1206_v61 = vpop.f32.mrb[17].mxu1 }
 0x13d   :  { %1104 = vst [vmem:[#allocation8 + $0x18] sm:$0xff] %v1040_v55   ;;  %1112 = vst [vmem:[#allocation8 + $0x58] sm:$0xff] %v1080_v57   ;;  %v1159_v62 = vadd.f32 %v1158_v60, %v1157_v58  ;;  %v1207_v63 = vadd.f32 %v1206_v61, %v1205_v59  ;;  %v1160_v0 = vpop.f32.mrb[18].mxu0  ;;  %v1208_v1 = vpop.f32.mrb[18].mxu1 }
 0x13e   :  { %v1161_v2 = vpop.f32.mrb[19].mxu0  ;;  %v1209_v3 = vpop.f32.mrb[19].mxu1 }
 0x13f   :  { %v1162_v4 = vadd.f32 %v1161_v2, %v1160_v0  ;;  %v1210_v5 = vadd.f32 %v1209_v3, %v1208_v1  ;;  %v707_v6 = vadd.f32 %v1159_v62, %v1445_v56  ;;  %v723_v7 = vadd.f32 %v1207_v63, %v1445_v56 }
 0x141   :  { %v708_v8 = vadd.f32 %v1162_v4, %v1445_v56  ;;  %v724_v9 = vadd.f32 %v1210_v5, %v1445_v56 }
 0x143   :  { %v1045_v10 = vpack.c.bf16 %v708_v8, %v707_v6  ;;  %v1085_v11 = vpack.c.bf16 %v724_v9, %v723_v7  ;;  %v1163_v12 = vpop.f32.mrb[20].mxu0  ;;  %v1211_v13 = vpop.f32.mrb[20].mxu1 }
 0x144   :  { %v1164_v14 = vpop.f32.mrb[21].mxu0  ;;  %v1212_v15 = vpop.f32.mrb[21].mxu1 }
 0x145   :  { %1105 = vst [vmem:[#allocation8 + $0x20] sm:$0xff] %v1045_v10   ;;  %1113 = vst [vmem:[#allocation8 + $0x60] sm:$0xff] %v1085_v11   ;;  %v1165_v16 = vadd.f32 %v1164_v14, %v1163_v12  ;;  %v1213_v17 = vadd.f32 %v1212_v15, %v1211_v13  ;;  %v1166_v18 = vpop.f32.mrb[22].mxu0  ;;  %v1214_v19 = vpop.f32.mrb[22].mxu1 }
 0x146   :  { %v1167_v20 = vpop.f32.mrb[23].mxu0  ;;  %v1215_v21 = vpop.f32.mrb[23].mxu1 }
 0x147   :  { %v1168_v22 = vadd.f32 %v1167_v20, %v1166_v18  ;;  %v1216_v23 = vadd.f32 %v1215_v21, %v1214_v19  ;;  %v709_v24 = vadd.f32 %v1165_v16, %v1445_v56  ;;  %v725_v25 = vadd.f32 %v1213_v17, %v1445_v56 }
 0x149   :  { %v710_v26 = vadd.f32 %v1168_v22, %v1445_v56  ;;  %v726_v27 = vadd.f32 %v1216_v23, %v1445_v56 }
 0x14b   :  { %v1050_v28 = vpack.c.bf16 %v710_v26, %v709_v24  ;;  %v1090_v29 = vpack.c.bf16 %v726_v27, %v725_v25  ;;  %v1169_v30 = vpop.f32.mrb[24].mxu0  ;;  %v1217_v31 = vpop.f32.mrb[24].mxu1 }
 0x14c   :  { %v1170_v32 = vpop.f32.mrb[25].mxu0  ;;  %v1218_v33 = vpop.f32.mrb[25].mxu1 }
 0x14d   :  { %1106 = vst [vmem:[#allocation8 + $0x28] sm:$0xff] %v1050_v28   ;;  %1114 = vst [vmem:[#allocation8 + $0x68] sm:$0xff] %v1090_v29   ;;  %v1171_v34 = vadd.f32 %v1170_v32, %v1169_v30  ;;  %v1219_v35 = vadd.f32 %v1218_v33, %v1217_v31  ;;  %v1172_v36 = vpop.f32.mrb[26].mxu0  ;;  %v1220_v37 = vpop.f32.mrb[26].mxu1 }
 0x14e   :  { %v1173_v38 = vpop.f32.mrb[27].mxu0  ;;  %v1221_v39 = vpop.f32.mrb[27].mxu1 }
 0x14f   :  { %v1174_v40 = vadd.f32 %v1173_v38, %v1172_v36  ;;  %v1222_v41 = vadd.f32 %v1221_v39, %v1220_v37  ;;  %v711_v42 = vadd.f32 %v1171_v34, %v1445_v56  ;;  %v727_v43 = vadd.f32 %v1219_v35, %v1445_v56 }
 0x151   :  { %v712_v44 = vadd.f32 %v1174_v40, %v1445_v56  ;;  %v728_v45 = vadd.f32 %v1222_v41, %v1445_v56 }
 0x153   :  { %v1055_v46 = vpack.c.bf16 %v712_v44, %v711_v42  ;;  %v1095_v47 = vpack.c.bf16 %v728_v45, %v727_v43  ;;  %v1175_v48 = vpop.f32.mrb[28].mxu0  ;;  %v1223_v49 = vpop.f32.mrb[28].mxu1 }
 0x154   :  { %v1176_v50 = vpop.f32.mrb[29].mxu0  ;;  %v1224_v51 = vpop.f32.mrb[29].mxu1 }
 0x155   :  { %1107 = vst [vmem:[#allocation8 + $0x30] sm:$0xff] %v1055_v46   ;;  %1115 = vst [vmem:[#allocation8 + $0x70] sm:$0xff] %v1095_v47   ;;  %v1177_v52 = vadd.f32 %v1176_v50, %v1175_v48  ;;  %v1225_v53 = vadd.f32 %v1224_v51, %v1223_v49  ;;  %v1178_v54 = vpop.f32.mrb[30].mxu0  ;;  %v1226_v55 = vpop.f32.mrb[30].mxu1 }
 0x156   :  { %v1179_v57 = vpop.f32.mrb[31].mxu0  ;;  %v1227_v58 = vpop.f32.mrb[31].mxu1 }
 0x157   :  { %v1180_v59 = vadd.f32 %v1179_v57, %v1178_v54  ;;  %v1228_v60 = vadd.f32 %v1227_v58, %v1226_v55  ;;  %v713_v61 = vadd.f32 %v1177_v52, %v1445_v56  ;;  %v729_v62 = vadd.f32 %v1225_v53, %v1445_v56 }
 0x159   :  { %v714_v63 = vadd.f32 %v1180_v59, %v1445_v56  ;;  %v730_v0 = vadd.f32 %v1228_v60, %v1445_v56 }
 0x15b   :  { %v1060_v1 = vpack.c.bf16 %v714_v63, %v713_v61  ;;  %v1100_v2 = vpack.c.bf16 %v730_v0, %v729_v62 }
 0x15d   :  { %1108 = vst [vmem:[#allocation8 + $0x38] sm:$0xff] %v1060_v1   ;;  %1116 = vst [vmem:[#allocation8 + $0x78] sm:$0xff] %v1100_v2  }
 0x15e   :  { %1371 = shalt.err (!%p1368_p6)
}
 0x15f   :  { %s1372_s17 = scalar_lea.hbm %s1497_s3, 2048 }
 0x160   :  { %p1373_p7 = scmp.ne.s32.totalorder %s1497_s3, %s1372_s17  ;;  %p1376_p8 = scmp.lt.u32.totalorder %s1372_s17, %s1497_s3 }
 0x162   :  { %p1378_p9 = pnand %p1376_p8, %p1373_p7 }
 0x164   :  { %1381 = shalt.err (!%p1378_p9)
}
 0x165   :  { %902 = dma.vmem_to_hbm [thread:$0]  %s897_s13, 2048, %s1497_s3, [#allocation5], %s1392_s0, %s1392_s0, %s1393_s9  }
 0x166   :  { %1386 = dma.done.wait [#allocation5], 2048  }
 0x167   :  { %1387 = vsyncadd [#allocation5], 4294965248 }
 0x168   :  { %906 = vsyncpa [#allocation4], 1 }
 0x169   :  { %907 = vsyncpa [#allocation7], 1 }
 0x16a   :  { %908 = vsyncpa [#allocation5], 1 }

</bundles_post_ra>
